<compile_context>
chip_gen: v7x
topology: tpu7x:2x2x1
jax: 0.10.0
libtpu: 0.0.40
codegen_flags: <defaults>
</compile_context>

<pallas_src>
import functools

import jax
import jax.numpy as jnp
from jax import lax
from jax.experimental import pallas as pl
from jax.experimental.pallas import tpu as pltpu

_NEG_BIG = -1e30  # finite "-inf": exp() underflows cleanly in f32, no NaN risk


def _round_up(x, m):
    return -(-x // m) * m


# ---------------------------------------------------------------------------
# Mode A: key matrix VMEM-resident, single-shot softmax per query tile.
# ---------------------------------------------------------------------------
def _csloss_resident_kernel(f1_ref, f2_ref, invk_ref, loss_ref, *,
                            inv_temp, eps, b_true, tile, needs_mask,
                            mxu_dtype):
    qi = pl.program_id(0)

    # Normalize + temperature-scale the query tile (rsqrt on the EUP).
    q = f1_ref[...].astype(jnp.float32)                       # (tile, D)
    q_sq = jnp.sum(q * q, axis=-1, keepdims=True)
    eps_sq = eps * eps
    inv_q = jnp.where(q_sq > eps_sq, lax.rsqrt(q_sq), 1.0 / eps)
    qn = (q * (inv_q * inv_temp)).astype(mxu_dtype)

    # Raw keys straight to the MXU (A.B^T form, no transpose); per-key inverse
    # norms are folded in after the matmul as a (1, B_pad) broadcast multiply.
    k = f2_ref[...]
    if k.dtype != jnp.dtype(mxu_dtype):
        k = k.astype(mxu_dtype)
    sim = lax.dot_general(qn, k,
                          dimension_numbers=(((1,), (1,)), ((), ())),
                          preferred_element_type=jnp.float32)  # (tile, B_pad)
    sim = sim * invk_ref[...]

    col = lax.broadcasted_iota(jnp.int32, sim.shape, 1)
    if needs_mask:
        sim = jnp.where(col < b_true, sim, _NEG_BIG)

    # Diagonal logits come from `sim` itself so they match the logsumexp
    # logits exactly (same rounding).
    row = lax.broadcasted_iota(jnp.int32, sim.shape, 0)
    diag = jnp.sum(jnp.where(col == qi * tile + row, sim, 0.0),
                   axis=-1, keepdims=True)                     # (tile, 1)

    m = jnp.max(sim, axis=-1, keepdims=True)
    lse = m + jnp.log(jnp.sum(jnp.exp(sim - m), axis=-1, keepdims=True))
    per_row = lse - diag
    if needs_mask:
        ridx = qi * tile + lax.broadcasted_iota(jnp.int32, per_row.shape, 0)
        per_row = jnp.where(ridx < b_true, per_row, 0.0)
    loss_ref[0, 0] = jnp.sum(per_row) * (1.0 / b_true)


# ---------------------------------------------------------------------------
# Mode B: flash-style key streaming with online logsumexp.
# ---------------------------------------------------------------------------
def _csloss_stream_kernel(f1_ref, f2_ref, invk_ref, loss_ref,
                          qn_sc, m_sc, l_sc, d_sc, *,
                          inv_temp, eps, b_true, tile, needs_mask,
                          mxu_dtype):
    qi = pl.program_id(0)
    ki = pl.program_id(1)
    nk = pl.num_programs(1)

    @pl.when(ki == 0)
    def _init():
        # Normalize + temperature-scale the query tile ONCE per query tile and
        # cache it (already in the MXU operand dtype) for all nk key steps.
        q = f1_ref[...].astype(jnp.float32)
        q_sq = jnp.sum(q * q, axis=-1, keepdims=True)
        eps_sq = eps * eps
        inv_q = jnp.where(q_sq > eps_sq, lax.rsqrt(q_sq), 1.0 / eps)
        qn_sc[...] = (q * (inv_q * inv_temp)).astype(qn_sc.dtype)
        m_sc[...] = jnp.full_like(m_sc, _NEG_BIG)
        l_sc[...] = jnp.zeros_like(l_sc)
        d_sc[...] = jnp.zeros_like(d_sc)

    # Raw key tile to the MXU; fold the precomputed inverse key norms in after
    # the matmul (one tile^2 broadcast-mul instead of re-normalizing the key
    # tile on every grid step).
    k = f2_ref[...]
    if k.dtype != jnp.dtype(mxu_dtype):
        k = k.astype(mxu_dtype)
    sim = lax.dot_general(qn_sc[...], k,
                          dimension_numbers=(((1,), (1,)), ((), ())),
                          preferred_element_type=jnp.float32)  # (tile, tile)
    sim = sim * invk_ref[...]

    if needs_mask:
        col = ki * tile + lax.broadcasted_iota(jnp.int32, sim.shape, 1)
        sim = jnp.where(col < b_true, sim, _NEG_BIG)

    # Diagonal logits live only in the qi == ki tile; extracted from `sim` so
    # they are numerically identical to the logsumexp logits.
    @pl.when(qi == ki)
    def _diag():
        r = lax.broadcasted_iota(jnp.int32, sim.shape, 0)
        c = lax.broadcasted_iota(jnp.int32, sim.shape, 1)
        d_sc[...] = jnp.sum(jnp.where(r == c, sim, 0.0), axis=-1,
                            keepdims=True)

    # Online logsumexp update.
    m_prev = m_sc[...]
    m_new = jnp.maximum(m_prev, jnp.max(sim, axis=-1, keepdims=True))
    l_sc[...] = (jnp.exp(m_prev - m_new) * l_sc[...]
                 + jnp.sum(jnp.exp(sim - m_new), axis=-1, keepdims=True))
    m_sc[...] = m_new

    @pl.when(ki == nk - 1)
    def _finalize():
        per_row = m_sc[...] + jnp.log(l_sc[...]) - d_sc[...]
        if needs_mask:
            ridx = qi * tile + lax.broadcasted_iota(jnp.int32,
                                                    per_row.shape, 0)
            per_row = jnp.where(ridx < b_true, per_row, 0.0)
        loss_ref[0, 0] = jnp.sum(per_row) * (1.0 / b_true)


# ---------------------------------------------------------------------------
# Wrapper
# ---------------------------------------------------------------------------
def cs_loss(f1, f2, temperature=0.07, eps=1e-8, max_tile=None, mxu_bf16=None,
            force_stream=False):
    """f1, f2: [B, D] feature batches. Returns scalar loss (float32)."""
    B, D = f1.shape
    assert f2.shape == (B, D)
    in_dtype = f1.dtype
    itemsize = jnp.dtype(in_dtype).itemsize

    # MXU operand dtype: bf16 inputs use the native bf16 MXU; f32 inputs stay
    # f32 unless the caller opts in (accuracy trade-off knob).
    if mxu_bf16 is None:
        mxu_bf16 = jnp.dtype(in_dtype) == jnp.dtype(jnp.bfloat16)
    mxu_dtype = jnp.bfloat16 if mxu_bf16 else jnp.float32

    if max_tile is None:
        # bf16 key tiles halve HBM bytes, so bigger tiles keep v6e above its
        # flops/byte knee; f32 stays at 256 (v5e-friendly, already MXU-bound).
        max_tile = 512 if mxu_bf16 else 256
    max_tile = max(8, int(max_tile))

    # VMEM capacity per TensorCore: 64 MiB on v7x, 128 MiB on v5e/v6e.
    vmem_cap = 64 << 20
    try:
        vmem_cap = int(pltpu.get_tpu_info().vmem_capacity_bytes)
    except Exception:
        pass
    vmem_ceiling = min(int(vmem_cap * 3 // 4), 96 << 20)

    b8 = _round_up(B, 8)

    def split_tile(limit):
        # Prefer >= 2 query tiles so the "parallel" qi axis feeds both
        # TensorCores on v7x.
        if b8 <= limit:
            return max(8, _round_up(-(-b8 // 2), 8)) if b8 > 8 else 8
        return limit

    def resident_bytes(tile, b_pad):
        return (2 * tile * D * itemsize            # query tile (double-buffered)
                + 2 * b_pad * D * itemsize         # resident key matrix
                + 2 * 8 * b_pad * 4                # inverse key norms
                + 6 * tile * b_pad * 4             # sim + softmax temporaries
                + 4 * tile * D * 4                 # f32 upcast temporaries
                + (2 << 20))                       # headroom

    mode, tile = None, None
    if not force_stream:
        # Prefer the key-resident single-pass kernel whenever it fits VMEM,
        # shrinking the query tile if needed (key traffic is tile-independent).
        for cand in (max_tile, 256, 128, 64, 32, 16, 8):
            if cand > max_tile:
                continue
            t = split_tile(cand)
            bp = _round_up(B, t)
            if resident_bytes(t, bp) <= vmem_ceiling:
                mode, tile = "resident", t
                break

    if mode is None:
        mode = "stream"
        if b8 > max_tile:
            # Streamed inverse-norm row has block (1, tile): keep tile a
            # multiple of 128 to satisfy the lane constraint.
            tile = max(128, (max_tile // 128) * 128)
        else:
            tile = b8                               # single key tile

    nq = -(-B // tile)
    b_pad = nq * tile
    needs_mask = b_pad != B

    if b_pad != B:
        pad = ((0, b_pad - B), (0, 0))
        f1 = jnp.pad(f1, pad)
        f2 = jnp.pad(f2, pad)

    # Per-key inverse norms computed once (matches max(||k||, eps) clamp).
    k32 = f2.astype(jnp.float32)
    inv_k = 1.0 / jnp.maximum(jnp.sqrt(jnp.sum(k32 * k32, axis=-1)), eps)
    inv_k = inv_k.reshape(1, b_pad)

    common = dict(inv_temp=1.0 / temperature, eps=eps, b_true=B, tile=tile,
                  needs_mask=needs_mask, mxu_dtype=mxu_dtype)

    if mode == "resident":
        kernel = functools.partial(_csloss_resident_kernel, **common)
        vmem_limit = int(min(max(resident_bytes(tile, b_pad), 16 << 20),
                             vmem_ceiling))
        partials = pl.pallas_call(
            kernel,
            out_shape=jax.ShapeDtypeStruct((nq, 1), jnp.float32),
            grid_spec=pltpu.PrefetchScalarGridSpec(
                num_scalar_prefetch=0,
                grid=(nq,),
                in_specs=[
                    pl.BlockSpec((tile, D), lambda qi: (qi, 0)),    # query tile
                    pl.BlockSpec((b_pad, D), lambda qi: (0, 0)),    # resident keys
                    pl.BlockSpec((1, b_pad), lambda qi: (0, 0)),    # 1/||k||
                ],
                out_specs=pl.BlockSpec((1, 1), lambda qi: (qi, 0),
                                       memory_space=pltpu.SMEM),
            ),
            compiler_params=pltpu.CompilerParams(
                dimension_semantics=("parallel",),
                vmem_limit_bytes=vmem_limit,
            ),
        )(f1, f2, inv_k)
    else:
        kernel = functools.partial(_csloss_stream_kernel, **common)
        stream_bytes = (4 * tile * D * itemsize                       # q + k tiles (2 bufs each)
                        + tile * D * jnp.dtype(mxu_dtype).itemsize    # cached qn
                        + 2 * 8 * tile * 4                            # inv_k tile
                        + 8 * tile * tile * 4                         # sim + softmax temporaries
                        + 4 * tile * D * 4                            # f32 upcast temporaries
                        + 3 * 128 * tile * 4                          # m/l/d scratch (lane-padded)
                        + (2 << 20))                                  # headroom
        vmem_limit = int(min(max(stream_bytes, 16 << 20), vmem_ceiling))
        partials = pl.pallas_call(
            kernel,
            out_shape=jax.ShapeDtypeStruct((nq, 1), jnp.float32),
            grid_spec=pltpu.PrefetchScalarGridSpec(
                num_scalar_prefetch=0,
                grid=(nq, nq),
                in_specs=[
                    pl.BlockSpec((tile, D), lambda qi, ki: (qi, 0)),  # query tile
                    pl.BlockSpec((tile, D), lambda qi, ki: (ki, 0)),  # key stream
                    pl.BlockSpec((1, tile), lambda qi, ki: (0, ki)),  # 1/||k||
                ],
                out_specs=pl.BlockSpec((1, 1), lambda qi, ki: (qi, 0),
                                       memory_space=pltpu.SMEM),
                scratch_shapes=[
                    pltpu.VMEM((tile, D), mxu_dtype),     # cached normalized q
                    pltpu.VMEM((tile, 1), jnp.float32),   # running max
                    pltpu.VMEM((tile, 1), jnp.float32),   # running sum-exp
                    pltpu.VMEM((tile, 1), jnp.float32),   # diagonal logits
                ],
            ),
            compiler_params=pltpu.CompilerParams(
                dimension_semantics=("parallel", "arbitrary"),
                vmem_limit_bytes=vmem_limit,
            ),
        )(f1, f2, inv_k)

    return jnp.sum(partials)


def cs_loss_ref(f1, f2, temperature=0.07, eps=1e-8):
    """Pure-JAX reference for correctness checking."""
    a = f1.astype(jnp.float32)
    b = f2.astype(jnp.float32)
    na = jnp.maximum(jnp.linalg.norm(a, axis=-1, keepdims=True), eps)
    nb = jnp.maximum(jnp.linalg.norm(b, axis=-1, keepdims=True), eps)
    sim = (a / na) @ (b / nb).T / temperature
    n = sim.shape[0]
    logp = jax.nn.log_softmax(sim, axis=-1)
    return -jnp.mean(logp[jnp.arange(n), jnp.arange(n)])


if __name__ == "__main__":
    key = jax.random.PRNGKey(0)
    k1, k2, k3, k4, k5, k6 = jax.random.split(key, 6)

    # 1) Small batch, f32 — key-resident single-pass path (single tile).
    B, D = 8, 32
    f1 = jax.random.normal(k1, (B, D), dtype=jnp.float32)
    f2 = jax.random.normal(k2, (B, D), dtype=jnp.float32)
    loss = cs_loss(f1, f2)
    jax.block_until_ready(loss)
    ref = cs_loss_ref(f1, f2)
    assert jnp.allclose(loss, ref, atol=1e-4, rtol=1e-4), (loss, ref)

    # 2) B not a tile multiple, f32 — resident path, 2 query tiles + padding
    #    masks + the "parallel" qi axis.
    B2, D2 = 20, 32
    g1 = jax.random.normal(k3, (B2, D2), dtype=jnp.float32)
    g2 = jax.random.normal(k4, (B2, D2), dtype=jnp.float32)
    loss2 = cs_loss(g1, g2)
    jax.block_until_ready(loss2)
    ref2 = cs_loss_ref(g1, g2)
    assert jnp.allclose(loss2, ref2, atol=1e-4, rtol=1e-4), (loss2, ref2)

    # 3) Streamed (flash-style) path: multiple key tiles, online LSE, padding.
    B3, D3 = 200, 32
    h1 = jax.random.normal(k5, (B3, D3), dtype=jnp.float32)
    h2 = jax.random.normal(k6, (B3, D3), dtype=jnp.float32)
    loss3 = cs_loss(h1, h2, max_tile=128, force_stream=True)
    jax.block_until_ready(loss3)
    ref3 = cs_loss_ref(h1, h2)
    assert jnp.allclose(loss3, ref3, atol=1e-4, rtol=1e-4), (loss3, ref3)

    # 4) bf16 inputs — bf16 MXU operands with f32 accumulation (loose tol).
    b1 = jax.random.normal(k1, (64, 128), dtype=jnp.float32)
    b2 = jax.random.normal(k2, (64, 128), dtype=jnp.float32)
    loss4 = cs_loss(b1.astype(jnp.bfloat16), b2.astype(jnp.bfloat16))
    jax.block_until_ready(loss4)
    ref4 = cs_loss_ref(b1, b2)
    assert jnp.allclose(loss4, ref4, atol=0.1, rtol=0.05), (loss4, ref4)

    print("KERNEL_OK")
</pallas_src>

<mosaic_0001>
module attributes {stable_mosaic.version = 11 : i64} {
  func.func @_csloss_resident_kernel(%arg0: i32, %arg1: memref<8x32xf32, #tpu.memory_space<vmem>>, %arg2: memref<8x32xf32, #tpu.memory_space<vmem>>, %arg3: memref<1x8xf32, #tpu.memory_space<vmem>>, %arg4: memref<1x1xf32, #tpu.memory_space<smem>>) attributes {dimension_semantics = [#tpu.dimension_semantics<parallel>], iteration_bounds = array<i64: 1>, scalar_prefetch = 0 : i64, scratch_operands = 0 : i64, tpu.core_type = #tpu.core_type<tc>, window_params = [{transform_indices = @transform_0, window_bounds = array<i64: 8, 32>}, {pipeline_mode = #tpu.pipeline_mode<synchronous>, transform_indices = @transform_1, window_bounds = array<i64: 8, 32>}, {pipeline_mode = #tpu.pipeline_mode<synchronous>, transform_indices = @transform_2, window_bounds = array<i64: 1, 8>}, {transform_indices = @transform_3, window_bounds = array<i64: 1, 1>}]} {
    %c0 = arith.constant 0 : index
    %c0_0 = arith.constant 0 : index
    %0 = vector.load %arg1[%c0, %c0_0] : memref<8x32xf32, #tpu.memory_space<vmem>>, vector<8x32xf32>
    %1 = arith.mulf %0, %0 : vector<8x32xf32>
    %cst = arith.constant dense<0.000000e+00> : vector<8xf32>
    %2 = vector.multi_reduction <add>, %1, %cst [1] : vector<8x32xf32> to vector<8xf32>
    %3 = vector.shape_cast %2 : vector<8xf32> to vector<8x1xf32>
    %cst_1 = arith.constant 1.000000e-16 : f32
    %4 = vector.broadcast %cst_1 : f32 to vector<8x1xf32>
    %5 = arith.cmpf ogt, %3, %4 : vector<8x1xf32>
    %6 = math.rsqrt %3 : vector<8x1xf32>
    %cst_2 = arith.constant 1.000000e+08 : f32
    %7 = vector.broadcast %cst_2 : f32 to vector<8x1xf32>
    %8 = arith.select %5, %6, %7 : vector<8x1xi1>, vector<8x1xf32>
    %cst_3 = arith.constant 14.2857141 : f32
    %9 = vector.broadcast %cst_3 : f32 to vector<8x1xf32>
    %10 = arith.mulf %8, %9 : vector<8x1xf32>
    %11 = vector.broadcast %10 : vector<8x1xf32> to vector<8x32xf32>
    %12 = arith.mulf %0, %11 : vector<8x32xf32>
    %c0_4 = arith.constant 0 : index
    %c0_5 = arith.constant 0 : index
    %13 = vector.load %arg2[%c0_4, %c0_5] : memref<8x32xf32, #tpu.memory_space<vmem>>, vector<8x32xf32>
    %cst_6 = arith.constant dense<0.000000e+00> : vector<8x8xf32>
    %14 = tpu.matmul %12, %13, %cst_6 {dimension_numbers = #tpu.dot_dimension_numbers<[1], [1], [0], [0], [0, 0, 1, 0], [], []>} : vector<8x32xf32>, vector<8x32xf32>, vector<8x8xf32> -> vector<8x8xf32>
    %c0_7 = arith.constant 0 : index
    %c0_8 = arith.constant 0 : index
    %15 = vector.load %arg3[%c0_7, %c0_8] : memref<1x8xf32, #tpu.memory_space<vmem>>, vector<1x8xf32>
    %16 = vector.broadcast %15 : vector<1x8xf32> to vector<8x8xf32>
    %17 = arith.mulf %14, %16 : vector<8x8xf32>
    %18 = tpu.iota {dimensions = array<i32: 1>} : vector<8x8xi32>
    %19 = tpu.iota {dimensions = array<i32: 0>} : vector<8x8xi32>
    %c8_i32 = arith.constant 8 : i32
    %20 = arith.muli %arg0, %c8_i32 : i32
    %21 = vector.broadcast %20 : i32 to vector<8x8xi32>
    %22 = arith.addi %21, %19 : vector<8x8xi32>
    %23 = arith.cmpi eq, %18, %22 : vector<8x8xi32>
    %cst_9 = arith.constant 0.000000e+00 : f32
    %24 = vector.broadcast %cst_9 : f32 to vector<8x8xf32>
    %25 = arith.select %23, %17, %24 : vector<8x8xi1>, vector<8x8xf32>
    %cst_10 = arith.constant dense<0.000000e+00> : vector<8xf32>
    %26 = vector.multi_reduction <add>, %25, %cst_10 [1] : vector<8x8xf32> to vector<8xf32>
    %27 = vector.shape_cast %26 : vector<8xf32> to vector<8x1xf32>
    %cst_11 = arith.constant dense<0xFF800000> : vector<8xf32>
    %28 = vector.multi_reduction <maximumf>, %17, %cst_11 [1] : vector<8x8xf32> to vector<8xf32>
    %29 = vector.shape_cast %28 : vector<8xf32> to vector<8x1xf32>
    %30 = vector.broadcast %29 : vector<8x1xf32> to vector<8x8xf32>
    %31 = arith.subf %17, %30 : vector<8x8xf32>
    %32 = math.exp %31 : vector<8x8xf32>
    %cst_12 = arith.constant dense<0.000000e+00> : vector<8xf32>
    %33 = vector.multi_reduction <add>, %32, %cst_12 [1] : vector<8x8xf32> to vector<8xf32>
    %34 = vector.shape_cast %33 : vector<8xf32> to vector<8x1xf32>
    %35 = math.log %34 : vector<8x1xf32>
    %36 = arith.addf %29, %35 : vector<8x1xf32>
    %37 = arith.subf %36, %27 : vector<8x1xf32>
    %38 = vector.shape_cast %37 : vector<8x1xf32> to vector<1x8x1xf32>
    %cst_13 = arith.constant dense<0.000000e+00> : vector<1xf32>
    %39 = vector.multi_reduction <add>, %38, %cst_13 [1, 2] : vector<1x8x1xf32> to vector<1xf32>
    %40 = vector.shape_cast %39 : vector<1xf32> to vector<1x1x1xf32>
    %41 = vector.extract %40[0, 0, 0] : f32 from vector<1x1x1xf32>
    %cst_14 = arith.constant 1.250000e-01 : f32
    %42 = arith.mulf %41, %cst_14 : f32
    %c0_15 = arith.constant 0 : index
    %c0_16 = arith.constant 0 : index
    %43 = memref.load %arg4[%c0_15, %c0_16] : memref<1x1xf32, #tpu.memory_space<smem>>
    memref.store %42, %arg4[%c0_15, %c0_16] : memref<1x1xf32, #tpu.memory_space<smem>>
    return
  }
  func.func @transform_0(%arg0: i32) -> (i32, i32) {
    %c0_i32 = arith.constant 0 : i32
    %c0_i32_0 = arith.constant 0 : i32
    return %arg0, %c0_i32 : i32, i32
  }
  func.func @transform_1(%arg0: i32) -> (i32, i32) {
    %c0_i32 = arith.constant 0 : i32
    %c0_i32_0 = arith.constant 0 : i32
    %c0_i32_1 = arith.constant 0 : i32
    return %c0_i32, %c0_i32_0 : i32, i32
  }
  func.func @transform_2(%arg0: i32) -> (i32, i32) {
    %c0_i32 = arith.constant 0 : i32
    %c0_i32_0 = arith.constant 0 : i32
    %c0_i32_1 = arith.constant 0 : i32
    return %c0_i32, %c0_i32_0 : i32, i32
  }
  func.func @transform_3(%arg0: i32) -> (i32, i32) {
    %c0_i32 = arith.constant 0 : i32
    %c0_i32_0 = arith.constant 0 : i32
    return %arg0, %c0_i32 : i32, i32
  }
}

</mosaic_0001>

<bundles_post_ra>
// kernel: tpu_custom_call.1
= control target key start
LH: loop header
LB: loop body
LE: loop exit
PB: predicated region body
PF: predicated region fallthrough
CT: control target
= control target key end

     0   :  { %8 = vsyncpa [#allocation3], 0  ;;  %s343_s0 = inlined_call_operand.hbm [shape: f32[8,32], index: 0, kind: input, shape index: {}]   ;;  %s344_s1 = inlined_call_operand.hbm [shape: f32[8,32], index: 1, kind: input, shape index: {}]   ;;  %s345_s2 = inlined_call_operand.vmem [shape: f32[1,8], index: 2, kind: input, shape index: {}]   ;;  %s346_s3 = inlined_call_operand.hbm [shape: f32[1,1], index: 3, kind: output, shape index: {}]  }
   0x1   :  { %9 = vsyncpa [#allocation6], 0 }
   0x2   :  { %10 = vsyncpa [#allocation4], 0  ;;  %s273_s12 = smov [#allocation2]   ;;  %s274_s14 = smov [#allocation5]  }
   0x3   :  { %s17_s13 = sshll.u32 %s273_s12, 4  ;;  %s27_s15 = sshll.u32 %s274_s14, 4  ;;  %s18_s13 = int_to_ptr.vmem [resolvable:$true] %s17_s13  ;;  %s28_s15 = int_to_ptr.vmem [resolvable:$true] %s27_s15 }
   0x4   :  { %s213_s18 = scalar_lea.hbm %s343_s0, 128 }
   0x5   :  { %p214_p0 = scmp.ne.s32.totalorder %s343_s0, %s213_s18  ;;  %p217_p1 = scmp.lt.u32.totalorder %s213_s18, %s343_s0 }
   0x7   :  { %p219_p2 = pnand %p217_p1, %p214_p0 }
   0x9   :  { %222 = shalt.err (!%p219_p2)
}
   0xa   :  { %s223_s23 = scalar_lea.vmem %s18_s13, 128  ;;  %p228_p4 = scmp.lt.s32.totalorder %s18_s13, %s18_s13 }
   0xb   :  { %p224_p3 = scmp.ne.s32.totalorder %s18_s13, %s223_s23  ;;  %p229_p5 = scmp.lt.s32.totalorder %s223_s23, %s223_s23 }
   0xd   :  { %p230_p6 = por %p229_p5, %p228_p4 }
   0xf   :  { %p231_p7 = pnand %p230_p6, %p224_p3 }
  0x11   :  { %234 = shalt.err (!%p231_p7)
}
  0x12   :  { %20 = dma.hbm_to_vmem [thread:$0]  %s343_s0, 128, %s18_s13, [#allocation3]  }
  0x13   :  { %s235_s28 = scalar_lea.hbm %s344_s1, 128 }
  0x14   :  { %p236_p8 = scmp.ne.s32.totalorder %s344_s1, %s235_s28  ;;  %p239_p9 = scmp.lt.u32.totalorder %s235_s28, %s344_s1 }
  0x16   :  { %p241_p10 = pnand %p239_p9, %p236_p8 }
  0x18   :  { %244 = shalt.err (!%p241_p10)
}
  0x19   :  { %s245_s6 = scalar_lea.vmem %s28_s15, 128  ;;  %p250_p12 = scmp.lt.s32.totalorder %s28_s15, %s28_s15 }
  0x1a   :  { %p246_p11 = scmp.ne.s32.totalorder %s28_s15, %s245_s6  ;;  %p251_p13 = scmp.lt.s32.totalorder %s245_s6, %s245_s6 }
  0x1c   :  { %p252_p0 = por %p251_p13, %p250_p12 }
  0x1e   :  { %p253_p1 = pnand %p252_p0, %p246_p11 }
  0x20   :  { %256 = shalt.err (!%p253_p1)
}
  0x21   :  { %30 = dma.hbm_to_vmem [thread:$0]  %s344_s1, 128, %s28_s15, [#allocation6]  }
  0x22   :  { %267 = dma.done.wait [#allocation3], 128  }
  0x23   :  { %268 = vsyncadd [#allocation3], 4294967168 }
  0x24   :  { %269 = dma.done.wait [#allocation6], 128  }
  0x25   :  { %270 = vsyncadd [#allocation6], 4294967168  ;;  %v39_v0 = vld [vmem:[#allocation2] sm:$0xff]  ;;  %vm41_vm0 = vcmask 261120   ;;  %v275_v3 = vmov 0.0   ;;  %v50_v4 = vld [vmem:[#allocation5] sm:$0xff]  ;;  %v135_v18 = vlaneseq }
  0x26   :  { %v40_v1 = vmul.f32 %v39_v0, %v39_v0  ;;  %195 = vmatprep.subr.mxu0 %v275_v3  ;;  %vm276_vm1 = vmmov 0   ;;  %v192_v10 = vld [vmem:[%s345_s2] ss:$0 sm:$0xff]  ;;  %vm144_vm3 = vcmask 64512   ;;  %vm161_vm5 = vcmask 7168   ;;  %s257_s12 = scalar_lea.hbm %s346_s3, 16 }
  0x27   :  { %196 = vmatpush3.xpose.msk.msra.mxu0 %vm41_vm0, %v50_v4  ;;  %197 = vmatprep.mubr.msk.f32.mxu0 %vm276_vm1, %v275_v3  ;;  %v136_v19 = vand.u32 127, %v135_v18  ;;  %v138_v20 = vshrl.u32 %v135_v18, 7  ;;  %p258_p2 = scmp.ne.s32.totalorder %s346_s3, %s257_s12  ;;  %p261_p3 = scmp.lt.u32.totalorder %s257_s12, %s346_s3 }
  0x28   :  { %v42_v2 = vsel %vm41_vm0, %v40_v1, 0.0 }
  0x29   :  { %43 = vadd.xlane.f32.xlu0 %v42_v2  ;;  %vm142_vm4 = vcmp.eq.s32.totalorder %v136_v19, %v138_v20  ;;  %p263_p4 = pnand %p261_p3, %p258_p2 }
  0xb6   :  { %v44_v5 = vpop.xlane.xlu0 %43 }
  0xb7   :  { %207 = vrsqrt.f32 %v44_v5  ;;  %vm45_vm2 = vcmp.gt.f32.partialorder %v44_v5, 1e-16 }
  0xc1   :  { %v208_v6 = vpop.eup %207 }
  0xc2   :  { %v47_v7 = vsel %vm45_vm2, %v208_v6, 1e+08 }
  0xc3   :  { %v48_v8 = vmul.f32 14.285714, %v47_v7 }
  0xc5   :  { %v49_v9 = vmul.f32 %v48_v8, %v39_v0 }
  0xc7   :  { %198 = vmatmul.mubr.msk.f32.vlgmr.msra.gmra.mrb[0].mxu0 %vm41_vm0, %v49_v9 }
 0x19a   :  { %v123_v11 = vpop.f32.mrb[0].mxu0 }
 0x19b   :  { %v134_v12 = vmul.f32 %v192_v10, %v123_v11  ;;  %v199_v13 = vpop.f32.mrb[1].mxu0 }
 0x19d   :  { %v148_v14 = vsel %vm144_vm3, %v134_v12, -inf  ;;  %v143_v23 = vsel %vm142_vm4, %v134_v12, 0.0 }
 0x19e   :  { %149 = vmax.xlane.f32.xlu0 %v148_v14  ;;  %v145_v24 = vsel %vm144_vm3, %v143_v23, 0.0 }
 0x22b   :  { %v150_v15 = vpop.xlane.xlu0 %149 }
 0x22c   :  { %v151_v16 = vsub.f32 %v134_v12, %v150_v15 }
 0x22e   :  { %v152_v17 = vmul.f32 1.442695, %v151_v16 }
 0x230   :  { %209 = vpow2.f32 %v152_v17 }
 0x23a   :  { %v210_v21 = vpop.eup %209 }
 0x23b   :  { %v154_v22 = vsel %vm144_vm3, %v210_v21, 0.0 }
 0x23c   :  { %155 = vadd.xlane.f32.xlu1 %v154_v22 }
 0x240   :  { %146 = vadd.xlane.f32.xlu1 %v145_v24 }
 0x2c9   :  { %v156_v25 = vpop.xlane.xlu1 %155 }
 0x2ca   :  { %211 = vlog2.f32 %v156_v25 }
 0x2cd   :  { %v147_v29 = vpop.xlane.xlu1 %146 }
 0x2d4   :  { %v212_v26 = vpop.eup %211 }
 0x2d5   :  { %v158_v27 = vmul.f32 0.6931472, %v212_v26 }
 0x2d7   :  { %v159_v28 = vadd.f32 %v158_v27, %v150_v15 }
 0x2d9   :  { %v160_v30 = vsub.f32 %v159_v28, %v147_v29 }
 0x2db   :  { %v162_v31 = vsel %vm161_vm5, %v160_v30, 0.0 }
 0x2dc   :  { %163 = vadd.xlane.f32.xlu0 %v162_v31 }
 0x369   :  { %v164_v32 = vpop.xlane.xlu0 %163 }
 0x36a   :  { %v165_v33 = vrot.slane %v164_v32, 4 }
 0x36c   :  { %v166_v34 = vadd.f32 %v165_v33, %v164_v32 }
 0x36e   :  { %v167_v35 = vrot.slane %v166_v34, 2 }
 0x370   :  { %v168_v36 = vadd.f32 %v167_v35, %v166_v34 }
 0x372   :  { %v169_v37 = vrot.slane %v168_v36, 1 }
 0x374   :  { %v170_v38 = vadd.f32 %v169_v37, %v168_v36 }
 0x376   :  { %200 = vpush %v170_v38 }
 0x3a7   :  { %s201_s2 = spop %200 }
 0x3a8   :  { %s172_s9 = smul.f32 0.125, %s201_s2 }
 0x3aa   :  { %174 = sst [smem:[#allocation7]] %s172_s9 }
 0x3ab   :  { %266 = shalt.err (!%p263_p4)
}
 0x3ac   :  { %s277_s17 = smov [#allocation7]  }
 0x3ad   :  { %182 = dma.smem_to_hbm %s277_s17, 16, %s346_s3, [#allocation4]  }
 0x3ae   :  { %271 = dma.done.wait [#allocation4], 16  }
 0x3af   :  { %272 = vsyncadd [#allocation4], 4294967280 }
 0x3b0   :  { %186 = sfence }
 0x3b1   :  { %187 = vsyncpa [#allocation3], 1 }
 0x3b2   :  { %188 = vsyncpa [#allocation6], 1 }
 0x3b3   :  { %189 = vsyncpa [#allocation4], 1 }

</bundles_post_ra>
